<compile_context>
chip_gen: v6e
topology: v6e:2x2x1
jax: 0.10.0
libtpu: 0.0.40
codegen_flags: <defaults>
</compile_context>

<pallas_src>
import functools

import jax
import jax.numpy as jnp
import numpy as np
from jax import lax
from jax.experimental import pallas as pl
from jax.experimental.pallas import tpu as pltpu

NEG_INF = -1e30       # sentinel for invalid (ignored / out-of-range) pixels
_STAT_LANES = 128     # stats vector width (one lane row)


# --------------------------------------------------------------------------- #
# shared fused per-pixel weighted cross entropy
# --------------------------------------------------------------------------- #
def _per_pixel_loss(logits_ref, labels_ref, *, ignore_index, hw, tile_p):
    """Returns (per_pixel_loss_f32 (1,TP), valid_mask (1,TP) bool).

    logits_ref: (C, TP) — classes on sublanes, pixels on lanes (input dtype).
    labels_ref: (1, TP) int32.
    Non-transcendental elementwise work stays in the input dtype (bf16-width
    VALU on v6e/v7x); exp / log-sum-exp / final NLL are done in f32.
    """
    x = logits_ref[...]                                  # (C, TP), input dtype
    t = labels_ref[...].astype(jnp.int32)                # (1, TP)

    # numerically stable log-softmax over the class (sublane) axis
    m = jnp.max(x, axis=0, keepdims=True)                # (1, TP), input dtype
    z = x - m                                            # input dtype
    lse = jnp.log(jnp.sum(jnp.exp(z.astype(jnp.float32)),
                          axis=0, keepdims=True))        # (1, TP) f32

    # gather z[target] via one-hot — exact even in bf16 (single nonzero term)
    cls_ids = lax.broadcasted_iota(jnp.int32, z.shape, 0)
    z_t = jnp.sum(jnp.where(cls_ids == t, z, jnp.zeros_like(z)),
                  axis=0, keepdims=True).astype(jnp.float32)
    nll = lse - z_t                                      # (1, TP) f32

    # static class weights: weight[0] = 0.1, rest 1.0  ->  lane-wise select
    w_pix = jnp.where(t == 0, jnp.float32(0.1), jnp.float32(1.0))
    per_pixel = w_pix * nll

    # lane validity: in-range pixel (ragged last tile) AND label != ignore_index
    lane = lax.broadcasted_iota(jnp.int32, t.shape, 1)
    pix = pl.program_id(1) * tile_p + lane
    valid = (t != ignore_index) & (pix < hw)
    return per_pixel, valid


# --------------------------------------------------------------------------- #
# kernel 1: per-tile OHEM partial statistics (no dense loss-map write)
# --------------------------------------------------------------------------- #
def _ohem_stats_kernel(logits_ref, labels_ref, stats_ref, *,
                       ignore_index, thresh, hw, tile_p):
    """stats_ref: (1, 128) f32 — lane0: #valid, lane1: sum(valid loss),
                                 lane2: #(loss>thresh), lane3: sum(loss>thresh)."""
    per_pixel, valid = _per_pixel_loss(
        logits_ref, labels_ref, ignore_index=ignore_index, hw=hw, tile_p=tile_p)

    hard = valid & (per_pixel > thresh)

    # Fuse the 4 reductions into one lane-reduce over a (4, TP) stack.
    stacked = jnp.concatenate(
        [valid.astype(jnp.float32),
         jnp.where(valid, per_pixel, 0.0),
         hard.astype(jnp.float32),
         jnp.where(hard, per_pixel, 0.0)], axis=0)          # (4, TP)
    sums = jnp.sum(stacked, axis=1, keepdims=True)           # (4, 1)

    # Scatter the 4 partial sums into lanes 0..3 of the stats row (vector-only).
    row = lax.broadcasted_iota(jnp.int32, (4, _STAT_LANES), 0)
    lane = lax.broadcasted_iota(jnp.int32, (4, _STAT_LANES), 1)
    placed = jnp.where(row == lane, sums, 0.0)                # (4, 128)
    stats_ref[...] = jnp.sum(placed, axis=0, keepdims=True)   # (1, 128)


# --------------------------------------------------------------------------- #
# kernel 2: dense per-pixel loss map (only used in the rare top-min_kept branch)
# --------------------------------------------------------------------------- #
def _loss_map_kernel(logits_ref, labels_ref, loss_ref, *,
                     ignore_index, hw, tile_p):
    per_pixel, valid = _per_pixel_loss(
        logits_ref, labels_ref, ignore_index=ignore_index, hw=hw, tile_p=tile_p)
    loss_ref[...] = jnp.where(valid, per_pixel, jnp.float32(NEG_INF))


# --------------------------------------------------------------------------- #
# tile sizing (generation aware)
# --------------------------------------------------------------------------- #
def _choose_tile_p(hw, num_classes, in_bytes, n_images):
    """Pick the lane tile and the scoped-VMEM limit for this TPU generation."""
    vmem_cap = 64 * 1024 * 1024                       # v7x floor as safe default
    try:
        info = pltpu.get_tpu_info()
        vmem_cap = int(getattr(info, "vmem_capacity_bytes", vmem_cap))
    except Exception:
        pass

    # Rough per-lane VMEM footprint: double-buffered logits + labels blocks,
    # plus ~3 f32 copies of the logits block for in-kernel intermediates.
    per_lane = 2 * num_classes * in_bytes + 2 * 4 + 3 * num_classes * 4
    budget = min(32 * 1024 * 1024, vmem_cap // 2)
    lanes = budget // max(1, per_lane)
    cap = max(1024, min(65536, (lanes // 128) * 128))

    tile = hw if hw <= cap else cap
    # Keep >= ~8 grid steps so the ("parallel","parallel") grid feeds both
    # TensorCores on v7x and the pipeline has enough stages; never below 1024.
    while n_images * ((hw + tile - 1) // tile) < 8 and tile > 1024:
        tile = max(1024, ((tile // 2) // 128) * 128)

    vmem_limit = int(min(vmem_cap * 3 // 4, 96 * 1024 * 1024))
    return tile, vmem_limit


# --------------------------------------------------------------------------- #
# pallas_call wrappers
# --------------------------------------------------------------------------- #
def _ohem_stats_pallas(logits, labels, *, ignore_index, thresh, tile_p, vmem_limit):
    N, C, HW = logits.shape
    n_tiles = pl.cdiv(HW, tile_p)
    kernel = functools.partial(_ohem_stats_kernel, ignore_index=ignore_index,
                               thresh=float(thresh), hw=HW, tile_p=tile_p)
    return pl.pallas_call(
        kernel,
        out_shape=jax.ShapeDtypeStruct((N, 1, n_tiles * _STAT_LANES), jnp.float32),
        grid=(N, n_tiles),
        in_specs=[
            pl.BlockSpec((None, C, tile_p), lambda n, i: (n, 0, i)),
            pl.BlockSpec((None, 1, tile_p), lambda n, i: (n, 0, i)),
        ],
        out_specs=pl.BlockSpec((None, 1, _STAT_LANES), lambda n, i: (n, 0, i)),
        compiler_params=pltpu.CompilerParams(
            dimension_semantics=("parallel", "parallel"),
            vmem_limit_bytes=vmem_limit),
    )(logits, labels)


def _loss_map_pallas(logits, labels, *, ignore_index, tile_p, vmem_limit):
    N, C, HW = logits.shape
    n_tiles = pl.cdiv(HW, tile_p)
    kernel = functools.partial(_loss_map_kernel, ignore_index=ignore_index,
                               hw=HW, tile_p=tile_p)
    return pl.pallas_call(
        kernel,
        out_shape=jax.ShapeDtypeStruct((N, 1, HW), jnp.float32),
        grid=(N, n_tiles),
        in_specs=[
            pl.BlockSpec((None, C, tile_p), lambda n, i: (n, 0, i)),
            pl.BlockSpec((None, 1, tile_p), lambda n, i: (n, 0, i)),
        ],
        out_specs=pl.BlockSpec((None, 1, tile_p), lambda n, i: (n, 0, i)),
        compiler_params=pltpu.CompilerParams(
            dimension_semantics=("parallel", "parallel"),
            vmem_limit_bytes=vmem_limit),
    )(logits, labels)


# --------------------------------------------------------------------------- #
# public forward
# --------------------------------------------------------------------------- #
@functools.partial(
    jax.jit, static_argnames=("num_classes", "thresh", "min_kept", "ignore_index"))
def ohem_cross_entropy_loss(pred_masks, gt_masks, *, num_classes,
                            thresh=0.7, min_kept=100000, ignore_index=255):
    """Forward pass equivalent to OHEMCrossEntropyLoss.forward.

    pred_masks: (N, C, H, W) float (NCHW); gt_masks: (N, H, W) int.
    Returns scalar float32 loss.
    """
    N, C, H, W = pred_masks.shape
    assert C == num_classes
    HW = H * W
    P = N * HW

    # free reshapes only — no transpose, no pad of the logits
    logits = pred_masks.reshape(N, C, HW)               # dtype kept (bf16 stays bf16)
    # TODO(synk): labels could stream as int16/uint8 (ignore_index=255 fits) to
    # cut read traffic for small C once narrow-dtype (1, tile_p) blocks are validated.
    labels = gt_masks.astype(jnp.int32).reshape(N, 1, HW)

    in_bytes = jnp.dtype(pred_masks.dtype).itemsize
    tile_p, vmem_limit = _choose_tile_p(HW, C, in_bytes, N)

    stats = _ohem_stats_pallas(logits, labels, ignore_index=ignore_index,
                               thresh=thresh, tile_p=tile_p, vmem_limit=vmem_limit)
    stats2 = stats.reshape(-1, _STAT_LANES)
    # Per-tile counts are exact in f32 (<= tile_p <= 2^16); accumulate as int32
    # so the min_kept comparisons stay exact for arbitrarily large N*H*W.
    v_cnt = jnp.sum(stats2[:, 0].astype(jnp.int32))
    t_cnt = jnp.sum(stats2[:, 2].astype(jnp.int32))
    sum_valid = jnp.sum(stats2[:, 1])
    sum_thr = jnp.sum(stats2[:, 3])

    mean_all = sum_valid / jnp.maximum(v_cnt.astype(jnp.float32), 1.0)
    mean_thr = sum_thr / jnp.maximum(t_cnt.astype(jnp.float32), 1.0)

    # ---- OHEM hard-example selection (nested conds: only the taken branch runs) ----
    k = max(1, min(int(min_kept), P))

    def _topk_mean():
        # Recompute the dense loss map only when the top-min_kept branch fires;
        # the two common branches never pay the N*HW*4 B write nor the top_k.
        # TODO(synk): torch.sort + boolean-mask gather (data-dependent shapes)
        # have no static-shape Pallas equivalent; an in-kernel loss histogram
        # (spare stats lanes) could replace this sort-class top_k for huge
        # min_kept at the cost of a bin-quantized cut-off.
        loss_map = _loss_map_pallas(logits, labels, ignore_index=ignore_index,
                                    tile_p=tile_p, vmem_limit=vmem_limit)
        vals, _ = lax.top_k(loss_map.reshape(-1), k)
        return jnp.sum(vals) / jnp.float32(k)

    def _hard_branch():
        return lax.cond(t_cnt >= min_kept, lambda: mean_thr, _topk_mean)

    result = lax.cond(
        v_cnt == 0,
        lambda: jnp.float32(0.0),
        lambda: lax.cond(v_cnt < min_kept, lambda: mean_all, _hard_branch),
    )
    return result.astype(jnp.float32)


# ---------------- pure-numpy reference (mirrors the PyTorch module) -------------
def _reference_loss(pred, gt, thresh, min_kept, ignore_index):
    pred = np.asarray(pred, np.float32)
    gt = np.asarray(gt, np.int64)
    N, C, H, W = pred.shape
    weights = np.ones((C,), np.float32)
    weights[0] = 0.1
    logits = pred.transpose(0, 2, 3, 1).reshape(-1, C)
    labels = gt.reshape(-1)
    valid = labels != ignore_index
    z = logits - logits.max(axis=-1, keepdims=True)
    logp = z - np.log(np.exp(z).sum(axis=-1, keepdims=True))
    safe_lab = np.where(valid, labels, 0)
    nll = -logp[np.arange(labels.size), safe_lab]
    px = np.where(valid, weights[safe_lab] * nll, 0.0)
    px = px[valid]
    if px.size == 0:
        return np.float32(0.0)
    px = np.sort(px)[::-1]
    if px.size < min_kept:
        kept = px
    else:
        tm = px > thresh
        kept = px[tm] if tm.sum() >= min_kept else px[:min_kept]
    return np.float32(kept.mean())


if __name__ == "__main__":
    key = jax.random.PRNGKey(0)
    k1, k2, k3 = jax.random.split(key, 3)

    N, C, H, W = 2, 4, 16, 16
    pred = jax.random.normal(k1, (N, C, H, W), jnp.float32) * 2.0
    gt = jax.random.randint(k2, (N, H, W), 0, C, jnp.int32)
    # mark ~10% of pixels as ignore_index
    ign = jax.random.uniform(k3, (N, H, W)) < 0.1
    gt = jnp.where(ign, 255, gt)

    configs = [
        dict(thresh=0.7, min_kept=100000),  # keep-all-valid branch (default min_kept)
        dict(thresh=0.7, min_kept=50),      # threshold branch (enough hard pixels)
        dict(thresh=100.0, min_kept=50),    # top-min_kept branch
    ]

    ok = True
    for cfg in configs:
        out = ohem_cross_entropy_loss(pred, gt, num_classes=C,
                                      ignore_index=255, **cfg)
        out = jax.block_until_ready(out)
        ref = _reference_loss(np.array(pred), np.array(gt),
                              cfg["thresh"], cfg["min_kept"], 255)
        if not np.allclose(np.array(out), ref, rtol=1e-4, atol=1e-4):
            ok = False
            print(f"MISMATCH cfg={cfg}: pallas={float(out):.6f} ref={float(ref):.6f}")

    if ok:
        print("KERNEL_OK")
</pallas_src>

<mosaic_0001>
module attributes {stable_mosaic.version = 11 : i64} {
  func.func @_ohem_stats_kernel(%arg0: i32, %arg1: i32, %arg2: memref<1x4x256xf32, #tpu.memory_space<vmem>>, %arg3: memref<1x1x256xi32, #tpu.memory_space<vmem>>, %arg4: memref<1x1x128xf32, #tpu.memory_space<vmem>>) attributes {dimension_semantics = [#tpu.dimension_semantics<parallel>, #tpu.dimension_semantics<parallel>], iteration_bounds = array<i64: 2, 1>, scalar_prefetch = 0 : i64, scratch_operands = 0 : i64, tpu.core_type = #tpu.core_type<tc>, window_params = [{transform_indices = @transform_0, window_bounds = array<i64: 1, 4, 256>}, {transform_indices = @transform_1, window_bounds = array<i64: 1, 1, 256>}, {transform_indices = @transform_2, window_bounds = array<i64: 1, 1, 128>}]} {
    %c0 = arith.constant 0 : index
    %c0_0 = arith.constant 0 : index
    %c0_1 = arith.constant 0 : index
    %0 = vector.load %arg2[%c0, %c0_0, %c0_1] : memref<1x4x256xf32, #tpu.memory_space<vmem>>, vector<1x4x256xf32>
    %1 = vector.shape_cast %0 : vector<1x4x256xf32> to vector<4x256xf32>
    %c0_2 = arith.constant 0 : index
    %c0_3 = arith.constant 0 : index
    %c0_4 = arith.constant 0 : index
    %2 = vector.load %arg3[%c0_2, %c0_3, %c0_4] : memref<1x1x256xi32, #tpu.memory_space<vmem>>, vector<1x1x256xi32>
    %3 = vector.shape_cast %2 : vector<1x1x256xi32> to vector<1x256xi32>
    %cst = arith.constant dense<0xFF800000> : vector<256xf32>
    %4 = vector.multi_reduction <maximumf>, %1, %cst [0] : vector<4x256xf32> to vector<256xf32>
    %5 = vector.shape_cast %4 : vector<256xf32> to vector<1x256xf32>
    %6 = vector.broadcast %5 : vector<1x256xf32> to vector<4x256xf32>
    %7 = arith.subf %1, %6 : vector<4x256xf32>
    %8 = math.exp %7 : vector<4x256xf32>
    %cst_5 = arith.constant dense<0.000000e+00> : vector<256xf32>
    %9 = vector.multi_reduction <add>, %8, %cst_5 [0] : vector<4x256xf32> to vector<256xf32>
    %10 = vector.shape_cast %9 : vector<256xf32> to vector<1x256xf32>
    %11 = math.log %10 : vector<1x256xf32>
    %12 = tpu.iota {dimensions = array<i32: 0>} : vector<4x256xi32>
    %13 = vector.broadcast %3 : vector<1x256xi32> to vector<4x256xi32>
    %14 = arith.cmpi eq, %12, %13 : vector<4x256xi32>
    %cst_6 = arith.constant 0.000000e+00 : f32
    %15 = vector.broadcast %cst_6 : f32 to vector<4x256xf32>
    %16 = arith.select %14, %7, %15 : vector<4x256xi1>, vector<4x256xf32>
    %cst_7 = arith.constant dense<0.000000e+00> : vector<256xf32>
    %17 = vector.multi_reduction <add>, %16, %cst_7 [0] : vector<4x256xf32> to vector<256xf32>
    %18 = vector.shape_cast %17 : vector<256xf32> to vector<1x256xf32>
    %19 = arith.subf %11, %18 : vector<1x256xf32>
    %c0_i32 = arith.constant 0 : i32
    %20 = vector.broadcast %c0_i32 : i32 to vector<1x256xi32>
    %21 = arith.cmpi eq, %3, %20 : vector<1x256xi32>
    %cst_8 = arith.constant 1.000000e-01 : f32
    %cst_9 = arith.constant 1.000000e+00 : f32
    %22 = vector.broadcast %cst_8 : f32 to vector<1x256xf32>
    %23 = vector.broadcast %cst_9 : f32 to vector<1x256xf32>
    %24 = arith.select %21, %22, %23 : vector<1x256xi1>, vector<1x256xf32>
    %25 = arith.mulf %24, %19 : vector<1x256xf32>
    %26 = tpu.iota {dimensions = array<i32: 1>} : vector<1x256xi32>
    %c256_i32 = arith.constant 256 : i32
    %27 = arith.muli %arg1, %c256_i32 : i32
    %28 = vector.broadcast %27 : i32 to vector<1x256xi32>
    %29 = arith.addi %28, %26 : vector<1x256xi32>
    %c255_i32 = arith.constant 255 : i32
    %30 = vector.broadcast %c255_i32 : i32 to vector<1x256xi32>
    %31 = arith.cmpi ne, %3, %30 : vector<1x256xi32>
    %c256_i32_10 = arith.constant 256 : i32
    %32 = vector.broadcast %c256_i32_10 : i32 to vector<1x256xi32>
    %33 = arith.cmpi slt, %29, %32 : vector<1x256xi32>
    %34 = arith.andi %31, %33 : vector<1x256xi1>
    %cst_11 = arith.constant 0.699999988 : f32
    %35 = vector.broadcast %cst_11 : f32 to vector<1x256xf32>
    %36 = arith.cmpf ogt, %25, %35 : vector<1x256xf32>
    %37 = arith.andi %34, %36 : vector<1x256xi1>
    %38 = arith.extui %34 : vector<1x256xi1> to vector<1x256xi32>
    %39 = arith.sitofp %38 : vector<1x256xi32> to vector<1x256xf32>
    %cst_12 = arith.constant 0.000000e+00 : f32
    %40 = vector.broadcast %cst_12 : f32 to vector<1x256xf32>
    %41 = arith.select %34, %25, %40 : vector<1x256xi1>, vector<1x256xf32>
    %42 = arith.extui %37 : vector<1x256xi1> to vector<1x256xi32>
    %43 = arith.sitofp %42 : vector<1x256xi32> to vector<1x256xf32>
    %cst_13 = arith.constant 0.000000e+00 : f32
    %44 = vector.broadcast %cst_13 : f32 to vector<1x256xf32>
    %45 = arith.select %37, %25, %44 : vector<1x256xi1>, vector<1x256xf32>
    %46 = tpu.concatenate %39, %41, %43, %45 in 0 : vector<1x256xf32>, vector<1x256xf32>, vector<1x256xf32>, vector<1x256xf32> -> vector<4x256xf32>
    %cst_14 = arith.constant dense<0.000000e+00> : vector<4xf32>
    %47 = vector.multi_reduction <add>, %46, %cst_14 [1] : vector<4x256xf32> to vector<4xf32>
    %48 = vector.shape_cast %47 : vector<4xf32> to vector<4x1xf32>
    %49 = tpu.iota {dimensions = array<i32: 0>} : vector<4x128xi32>
    %50 = tpu.iota {dimensions = array<i32: 1>} : vector<4x128xi32>
    %51 = arith.cmpi eq, %49, %50 : vector<4x128xi32>
    %cst_15 = arith.constant 0.000000e+00 : f32
    %52 = vector.shape_cast %48 : vector<4x1xf32> to vector<4x1xf32>
    %53 = vector.broadcast %52 : vector<4x1xf32> to vector<4x128xf32>
    %54 = vector.broadcast %cst_15 : f32 to vector<4x128xf32>
    %55 = arith.select %51, %53, %54 : vector<4x128xi1>, vector<4x128xf32>
    %cst_16 = arith.constant dense<0.000000e+00> : vector<128xf32>
    %56 = vector.multi_reduction <add>, %55, %cst_16 [0] : vector<4x128xf32> to vector<128xf32>
    %57 = vector.shape_cast %56 : vector<128xf32> to vector<1x128xf32>
    %c0_17 = arith.constant 0 : index
    %c0_18 = arith.constant 0 : index
    %c0_19 = arith.constant 0 : index
    %58 = vector.load %arg4[%c0_17, %c0_18, %c0_19] : memref<1x1x128xf32, #tpu.memory_space<vmem>>, vector<1x1x128xf32>
    %59 = vector.shape_cast %58 : vector<1x1x128xf32> to vector<1x128xf32>
    %60 = vector.shape_cast %57 : vector<1x128xf32> to vector<1x1x128xf32>
    tpu.vector_store %arg4[%c0_17, %c0_18, %c0_19], %60 {strides = array<i32>} : memref<1x1x128xf32, #tpu.memory_space<vmem>>, vector<1x1x128xf32>,
    return
  }
  func.func @transform_0(%arg0: i32, %arg1: i32) -> (i32, i32, i32) {
    %c0_i32 = arith.constant 0 : i32
    %c0_i32_0 = arith.constant 0 : i32
    return %arg0, %c0_i32, %arg1 : i32, i32, i32
  }
  func.func @transform_1(%arg0: i32, %arg1: i32) -> (i32, i32, i32) {
    %c0_i32 = arith.constant 0 : i32
    %c0_i32_0 = arith.constant 0 : i32
    return %arg0, %c0_i32, %arg1 : i32, i32, i32
  }
  func.func @transform_2(%arg0: i32, %arg1: i32) -> (i32, i32, i32) {
    %c0_i32 = arith.constant 0 : i32
    %c0_i32_0 = arith.constant 0 : i32
    return %arg0, %c0_i32, %arg1 : i32, i32, i32
  }
}

module attributes {stable_mosaic.version = 11 : i64} {
  func.func @_loss_map_kernel(%arg0: i32, %arg1: i32, %arg2: memref<1x4x256xf32, #tpu.memory_space<vmem>>, %arg3: memref<1x1x256xi32, #tpu.memory_space<vmem>>, %arg4: memref<1x1x256xf32, #tpu.memory_space<vmem>>) attributes {dimension_semantics = [#tpu.dimension_semantics<parallel>, #tpu.dimension_semantics<parallel>], iteration_bounds = array<i64: 2, 1>, scalar_prefetch = 0 : i64, scratch_operands = 0 : i64, tpu.core_type = #tpu.core_type<tc>, window_params = [{transform_indices = @transform_0, window_bounds = array<i64: 1, 4, 256>}, {transform_indices = @transform_1, window_bounds = array<i64: 1, 1, 256>}, {transform_indices = @transform_2, window_bounds = array<i64: 1, 1, 256>}]} {
    %c0 = arith.constant 0 : index
    %c0_0 = arith.constant 0 : index
    %c0_1 = arith.constant 0 : index
    %0 = vector.load %arg2[%c0, %c0_0, %c0_1] : memref<1x4x256xf32, #tpu.memory_space<vmem>>, vector<1x4x256xf32>
    %1 = vector.shape_cast %0 : vector<1x4x256xf32> to vector<4x256xf32>
    %c0_2 = arith.constant 0 : index
    %c0_3 = arith.constant 0 : index
    %c0_4 = arith.constant 0 : index
    %2 = vector.load %arg3[%c0_2, %c0_3, %c0_4] : memref<1x1x256xi32, #tpu.memory_space<vmem>>, vector<1x1x256xi32>
    %3 = vector.shape_cast %2 : vector<1x1x256xi32> to vector<1x256xi32>
    %cst = arith.constant dense<0xFF800000> : vector<256xf32>
    %4 = vector.multi_reduction <maximumf>, %1, %cst [0] : vector<4x256xf32> to vector<256xf32>
    %5 = vector.shape_cast %4 : vector<256xf32> to vector<1x256xf32>
    %6 = vector.broadcast %5 : vector<1x256xf32> to vector<4x256xf32>
    %7 = arith.subf %1, %6 : vector<4x256xf32>
    %8 = math.exp %7 : vector<4x256xf32>
    %cst_5 = arith.constant dense<0.000000e+00> : vector<256xf32>
    %9 = vector.multi_reduction <add>, %8, %cst_5 [0] : vector<4x256xf32> to vector<256xf32>
    %10 = vector.shape_cast %9 : vector<256xf32> to vector<1x256xf32>
    %11 = math.log %10 : vector<1x256xf32>
    %12 = tpu.iota {dimensions = array<i32: 0>} : vector<4x256xi32>
    %13 = vector.broadcast %3 : vector<1x256xi32> to vector<4x256xi32>
    %14 = arith.cmpi eq, %12, %13 : vector<4x256xi32>
    %cst_6 = arith.constant 0.000000e+00 : f32
    %15 = vector.broadcast %cst_6 : f32 to vector<4x256xf32>
    %16 = arith.select %14, %7, %15 : vector<4x256xi1>, vector<4x256xf32>
    %cst_7 = arith.constant dense<0.000000e+00> : vector<256xf32>
    %17 = vector.multi_reduction <add>, %16, %cst_7 [0] : vector<4x256xf32> to vector<256xf32>
    %18 = vector.shape_cast %17 : vector<256xf32> to vector<1x256xf32>
    %19 = arith.subf %11, %18 : vector<1x256xf32>
    %c0_i32 = arith.constant 0 : i32
    %20 = vector.broadcast %c0_i32 : i32 to vector<1x256xi32>
    %21 = arith.cmpi eq, %3, %20 : vector<1x256xi32>
    %cst_8 = arith.constant 1.000000e-01 : f32
    %cst_9 = arith.constant 1.000000e+00 : f32
    %22 = vector.broadcast %cst_8 : f32 to vector<1x256xf32>
    %23 = vector.broadcast %cst_9 : f32 to vector<1x256xf32>
    %24 = arith.select %21, %22, %23 : vector<1x256xi1>, vector<1x256xf32>
    %25 = arith.mulf %24, %19 : vector<1x256xf32>
    %26 = tpu.iota {dimensions = array<i32: 1>} : vector<1x256xi32>
    %c256_i32 = arith.constant 256 : i32
    %27 = arith.muli %arg1, %c256_i32 : i32
    %28 = vector.broadcast %27 : i32 to vector<1x256xi32>
    %29 = arith.addi %28, %26 : vector<1x256xi32>
    %c255_i32 = arith.constant 255 : i32
    %30 = vector.broadcast %c255_i32 : i32 to vector<1x256xi32>
    %31 = arith.cmpi ne, %3, %30 : vector<1x256xi32>
    %c256_i32_10 = arith.constant 256 : i32
    %32 = vector.broadcast %c256_i32_10 : i32 to vector<1x256xi32>
    %33 = arith.cmpi slt, %29, %32 : vector<1x256xi32>
    %34 = arith.andi %31, %33 : vector<1x256xi1>
    %cst_11 = arith.constant -1.000000e+30 : f32
    %35 = vector.broadcast %cst_11 : f32 to vector<1x256xf32>
    %36 = arith.select %34, %25, %35 : vector<1x256xi1>, vector<1x256xf32>
    %c0_12 = arith.constant 0 : index
    %c0_13 = arith.constant 0 : index
    %c0_14 = arith.constant 0 : index
    %37 = vector.load %arg4[%c0_12, %c0_13, %c0_14] : memref<1x1x256xf32, #tpu.memory_space<vmem>>, vector<1x1x256xf32>
    %38 = vector.shape_cast %37 : vector<1x1x256xf32> to vector<1x256xf32>
    %39 = vector.shape_cast %36 : vector<1x256xf32> to vector<1x1x256xf32>
    tpu.vector_store %arg4[%c0_12, %c0_13, %c0_14], %39 {strides = array<i32>} : memref<1x1x256xf32, #tpu.memory_space<vmem>>, vector<1x1x256xf32>,
    return
  }
  func.func @transform_0(%arg0: i32, %arg1: i32) -> (i32, i32, i32) {
    %c0_i32 = arith.constant 0 : i32
    %c0_i32_0 = arith.constant 0 : i32
    return %arg0, %c0_i32, %arg1 : i32, i32, i32
  }
  func.func @transform_1(%arg0: i32, %arg1: i32) -> (i32, i32, i32) {
    %c0_i32 = arith.constant 0 : i32
    %c0_i32_0 = arith.constant 0 : i32
    return %arg0, %c0_i32, %arg1 : i32, i32, i32
  }
  func.func @transform_2(%arg0: i32, %arg1: i32) -> (i32, i32, i32) {
    %c0_i32 = arith.constant 0 : i32
    %c0_i32_0 = arith.constant 0 : i32
    return %arg0, %c0_i32, %arg1 : i32, i32, i32
  }
}

</mosaic_0001>

<bundles_post_ra>
// kernel: ohem_cross_entropy_loss.1
= control target key start
LH: loop header
LB: loop body
LE: loop exit
PB: predicated region body
PF: predicated region fallthrough
CT: control target
= control target key end

     0   :  { %s593_s9 = smov 0   ;;  %s595_s10 = smov 0   ;;  %s673_s0 = inlined_call_operand.vmem [shape: f32[2,4,256], index: 0, kind: input, shape index: {}]   ;;  %s674_s1 = inlined_call_operand.vmem [shape: s32[2,1,256], index: 1, kind: input, shape index: {}]   ;;  %s675_s2 = inlined_call_operand.vmem [shape: f32[2,1,128], index: 2, kind: output, shape index: {}]  }
   0x1   :  { %s597_s11 = smov 0  }
   0x2 LB: > { %s24_s12 = sadd.s32 1, %s568_s10  ;;  %p506_p0 = scmp.ge.s32.totalorder %s572_s11, 1  ;;  %s572_s11 = sphi %s597_s11, %s12_s11   ;;  %s568_s10 = sphi %s595_s10, %s677_s10   ;;  %s564_s9 = sphi %s593_s9, %s676_s9  }
   0x3   : > { %p26_p1 = scmp.ge.s32.totalorder %s24_s12, 2  ;;  %p149_p2 = scmp.lt.s32.totalorder %s572_s11, 3 }
   0x5   : > { %s679_s12 = smov (%p26_p1, %s24_s12), 0  ;;  %p150_p3 = pnand %p506_p0, %p149_p2 }
   0x6   : > { %p185_p4 = scmp.lt.s32.totalorder (!%p150_p3), %s564_s9, 1 }
   0x7   : > { %153 = sbr.rel (%p150_p3) target bundleno = 255 (0xff), region = 28 }
   0xc   : > { %s681_s9 = smov (!%p185_p4, %s564_s9), 1  ;;  %vm214_vm0 = vcmask 1043456   ;;  %v257_v17 = vlaneseq  ;;  %v574_v50 = vmov 1966171168   ;;  %v575_v59 = vmov 1  }
   0xd   : > { %s514_s13 = sshll.u32 %s681_s9, 3  ;;  %s509_s17 = sshll.u32 %s681_s9, 1  ;;  %v296_v51 = vunpack.c.l.s4 %v574_v50  ;;  %v323_v60 = vcombine.low %v575_v59, %v575_v59  ;;  %vm392_vm9 = vcmask 1040384   ;;  %vm395_vm10 = vcmask 1041408  }
   0xe   : > { %s192_s16 = scalar_lea.vmem %s673_s0, %s514_s13  ;;  %v621_v20 = vshrl.u32 %v257_v17, 7  ;;  %s201_s20 = scalar_lea.vmem %s674_s1, %s509_s17  ;;  %vm398_vm11 = vcmask 1042432  }
   0xf   : > { %v209_v0 = vld [vmem:[%s192_s16] sm:$0xff]  ;;  %v297_v55 = vunpack.c.0.s8 %v296_v51  ;;  %s208_s23 = scalar_lea.vmem %s675_s2, %s681_s9 }
  0x10   : > { %v212_v1 = vcombine.high %v209_v0, %v209_v0  ;;  %v215_v2 = vsel %vm214_vm0, %v209_v0, -inf  ;;  %v627_v21 = vsub.s32 0, %v621_v20  ;;  %v629_v22 = vld [vmem:[%s201_s20] sm:$0x3]  ;;  %v632_v23 = vsub.s32 1, %v621_v20 }
  0x11   : > { %v216_v3 = vrot.slane %v215_v2, 4  ;;  %v300_v58 = vsub.s32 %v297_v55, %v621_v20  ;;  %vm318_vm3 = vcmp.ne.s32.totalorder %v629_v22, 255  ;;  %vm290_vm5 = vcmp.eq.s32.totalorder %v629_v22, 0 }
  0x12   : > { %v222_v4 = vsel %vm214_vm0, %v212_v1, -inf  ;;  %v262_v24 = vrot.slane %v629_v22, %v627_v21  ;;  %v266_v25 = vrot.slane %v629_v22, %v632_v23 }
  0x13   : > { %v217_v5 = vmax.f32 %v215_v2, %v216_v3  ;;  %v223_v6 = vrot.slane %v222_v4, 4  ;;  %v330_v63 = vrot.slane %v323_v60, %v300_v58 }
  0x14   : > { %vm267_vm1 = vcmp.eq.s32.totalorder %v621_v20, %v262_v24  ;;  %vm268_vm2 = vcmp.eq.s32.totalorder %v621_v20, %v266_v25 }
  0x15   : > { %v218_v7 = vrot.slane %v217_v5, 2  ;;  %v224_v8 = vmax.f32 %v222_v4, %v223_v6 }
  0x17   : > { %v219_v9 = vmax.f32 %v217_v5, %v218_v7  ;;  %v225_v10 = vrot.slane %v224_v8, 2  ;;  %v337_v5 = vrot.slane %v330_v63, %v300_v58 }
  0x19   : > { %v220_v11 = vrot.slane %v219_v9, 1  ;;  %v226_v12 = vmax.f32 %v224_v8, %v225_v10  ;;  %vm338_vm4 = vcmp.ne.s32.totalorder %v337_v5, 0 }
  0x1a   : > { %vm339_vm6 = vmand %vm318_vm3, %vm338_vm4 }
  0x1b   : > { %v221_v13 = vmax.f32 %v219_v9, %v220_v11  ;;  %v227_v14 = vrot.slane %v226_v12, 1  ;;  %v576_v11 = vmov 1.0  }
  0x1d   : > { %v228_v15 = vmax.f32 %v226_v12, %v227_v14  ;;  %v291_v12 = vsel %vm290_vm5, 0.1, %v576_v11  ;;  %v577_v14 = vmov 0.0  }
  0x1f   : > { %v231_v16 = vcombine.low %v221_v13, %v228_v15  ;;  %v510_v15 = vsel %vm339_vm6, 1.0, %v577_v14 }
  0x20   : > { %v356_v24 = vrot.slane %v510_v15, %v632_v23 }
  0x21   : > { %v233_v18 = vsub.f32 %v209_v0, %v231_v16 }
  0x23   : > { %v234_v19 = vmul.f32 1.442695, %v233_v18  ;;  %v270_v26 = vcombine.high %v233_v18, %v233_v18  ;;  %v272_v28 = vsel %vm267_vm1, %v233_v18, 0.0 }
  0x24   : > { %v274_v34 = vsel %vm214_vm0, %v272_v28, 0.0 }
  0x25   : > { %544 = vpow2.f32 %v234_v19  ;;  %v273_v32 = vsel %vm268_vm2, %v270_v26, 0.0  ;;  %v275_v40 = vrot.slane %v274_v34, 4  ;;  %v352_v19 = vrot.slane %v510_v15, %v627_v21 }
  0x26   : > { %v281_v37 = vsel %vm214_vm0, %v273_v32, 0.0 }
  0x27   : > { %v282_v43 = vrot.slane %v281_v37, 4  ;;  %v276_v46 = vadd.f32 %v275_v40, %v274_v34 }
  0x29   : > { %v283_v49 = vadd.f32 %v282_v43, %v281_v37  ;;  %v277_v53 = vrot.slane %v276_v46, 2 }
  0x2b   : > { %v284_v54 = vrot.slane %v283_v49, 2  ;;  %v278_v56 = vadd.f32 %v277_v53, %v276_v46 }
  0x2d   : > { %v285_v57 = vadd.f32 %v284_v54, %v283_v49  ;;  %v279_v61 = vrot.slane %v278_v56, 1 }
  0x2f   : > { %v286_v62 = vrot.slane %v285_v57, 1  ;;  %v280_v0 = vadd.f32 %v279_v61, %v278_v56 }
  0x31   : > { %v287_v3 = vadd.f32 %v286_v62, %v285_v57 }
  0x32   : > { %v545_v27 = vpop.eup %544 }
  0x33   : > { %v237_v29 = vcombine.high %v545_v27, %v545_v27  ;;  %v239_v30 = vsel %vm214_vm0, %v545_v27, 0.0 }
  0x34   : > { %v240_v31 = vrot.slane %v239_v30, 4 }
  0x35   : > { %v246_v33 = vsel %vm214_vm0, %v237_v29, 0.0 }
  0x36   : > { %v241_v35 = vadd.f32 %v240_v31, %v239_v30  ;;  %v247_v36 = vrot.slane %v246_v33, 4 }
  0x38   : > { %v242_v38 = vrot.slane %v241_v35, 2  ;;  %v248_v39 = vadd.f32 %v247_v36, %v246_v33 }
  0x3a   : > { %v243_v41 = vadd.f32 %v242_v38, %v241_v35  ;;  %v249_v42 = vrot.slane %v248_v39, 2 }
  0x3c   : > { %v244_v44 = vrot.slane %v243_v41, 1  ;;  %v250_v45 = vadd.f32 %v249_v42, %v248_v39 }
  0x3e   : > { %v245_v47 = vadd.f32 %v244_v44, %v243_v41  ;;  %v251_v48 = vrot.slane %v250_v45, 1  ;;  %v312_v41 = vand.u32 127, %v257_v17 }
  0x40   : > { %v252_v52 = vadd.f32 %v251_v48, %v250_v45  ;;  %546 = vlog2.f32 %v245_v47  ;;  %vm406_vm12 = vcmp.eq.s32.totalorder %v621_v20, %v312_v41 }
  0x42   : > { %548 = vlog2.f32 %v252_v52 }
  0x4d   : > { %v547_v1 = vpop.eup %546 }
  0x4e   : > { %v254_v2 = vmul.f32 0.6931472, %v547_v1 }
  0x4f   : > { %v549_v4 = vpop.eup %548 }
  0x50   : > { %v256_v6 = vmul.f32 0.6931472, %v549_v4  ;;  %v288_v7 = vsub.f32 %v254_v2, %v280_v0 }
  0x52   : > { %v289_v8 = vsub.f32 %v256_v6, %v287_v3 }
  0x54   : > { %v294_v9 = vcombine.low %v288_v7, %v289_v8 }
  0x56   : > { %v301_v10 = vrot.slane %v294_v9, %v300_v58 }
  0x58   : > { %v308_v13 = vrot.slane %v301_v10, %v300_v58 }
  0x5a   : > { %v310_v16 = vmul.f32 %v308_v13, %v291_v12 }
  0x5c   : > { %vm340_vm7 = vcmp.gt.f32.partialorder %v310_v16, 0.7  ;;  %v344_v18 = vsel %vm339_vm6, %v310_v16, 0.0 }
  0x5d   : > { %vm341_vm8 = vmand %vm339_vm6, %vm340_vm7  ;;  %v363_v25 = vrot.slane %v344_v18, %v627_v21  ;;  %v367_v22 = vrot.slane %v344_v18, %v632_v23 }
  0x5e   : > { %v511_v26 = vsel %vm341_vm8, 1.0, %v577_v14  ;;  %v347_v27 = vsel %vm341_vm8, %v310_v16, 0.0 }
  0x5f   : > { %v374_v28 = vrot.slane %v511_v26, %v627_v21  ;;  %v378_v29 = vrot.slane %v511_v26, %v632_v23  ;;  %v385_v30 = vrot.slane %v347_v27, %v627_v21  ;;  %v389_v31 = vrot.slane %v347_v27, %v632_v23 }
  0x60   : > { %v393_v32 = vsel %vm392_vm9, %v352_v19, %v363_v25  ;;  %v394_v33 = vsel %vm392_vm9, %v356_v24, %v367_v22 }
  0x61   : > { %v396_v34 = vsel %vm395_vm10, %v393_v32, %v374_v28  ;;  %v397_v35 = vsel %vm395_vm10, %v394_v33, %v378_v29 }
  0x62   : > { %v399_v36 = vsel %vm398_vm11, %v396_v34, %v385_v30  ;;  %v400_v37 = vsel %vm398_vm11, %v397_v35, %v389_v31 }
  0x63   : > { %v401_v38 = vsel %vm214_vm0, %v399_v36, 0.0  ;;  %v402_v39 = vsel %vm214_vm0, %v400_v37, 0.0 }
  0x64   : > { %v403_v40 = vadd.f32 %v402_v39, %v401_v38 }
  0x66   : > { %404 = vadd.xlane.f32.xlu0 %v403_v40 }
  0xef   : > { %v405_v21 = vpop.xlane.xlu0 %404 }
  0xf0   : > { %v407_v42 = vsel %vm406_vm12, %v405_v21, 0.0 }
  0xf1   : > { %v408_v23 = vsel %vm214_vm0, %v407_v42, 0.0 }
  0xf2   : > { %v409_v43 = vrot.slane %v408_v23, 4 }
  0xf4   : > { %v410_v44 = vadd.f32 %v409_v43, %v408_v23 }
  0xf6   : > { %v411_v45 = vrot.slane %v410_v44, 2 }
  0xf8   : > { %v412_v46 = vadd.f32 %v411_v45, %v410_v44 }
  0xfa   : > { %v413_v47 = vrot.slane %v412_v46, 1 }
  0xfc   : > { %v414_v48 = vadd.f32 %v413_v47, %v412_v46 }
  0xfe   : > { %415 = vst [vmem:[%s208_s23] sm:$0x1] %v414_v48 }
  0xff PF: > { %s12_s11 = sadd.s32 1, %s572_s11   ;;  %s676_s9 = smov %s568_s10 }
 0x100   : > { %p9_p5 = scmp.ge.s32.totalorder %s12_s11, 4   ;;  %s677_s10 = smov %s679_s12 }
 0x102   :  { %11 = sbr.rel (!%p9_p5) target bundleno = 2 (0x2), region = 61 }

// kernel: branch_0_fun.1
= control target key start
LH: loop header
LB: loop body
LE: loop exit
PB: predicated region body
PF: predicated region fallthrough
CT: control target
= control target key end

     0   :  { %s535_s9 = smov 0   ;;  %s537_s10 = smov 0   ;;  %s593_s0 = inlined_call_operand.vmem [shape: f32[2,4,256], index: 0, kind: input, shape index: {}]   ;;  %s594_s1 = inlined_call_operand.vmem [shape: s32[2,1,256], index: 1, kind: input, shape index: {}]   ;;  %s595_s2 = inlined_call_operand.vmem [shape: f32[2,1,256], index: 2, kind: output, shape index: {}]  }
   0x1   :  { %s539_s11 = smov 0  }
   0x2 LB: > { %s24_s12 = sadd.s32 1, %s511_s10  ;;  %p451_p0 = scmp.ge.s32.totalorder %s515_s11, 1  ;;  %s515_s11 = sphi %s539_s11, %s12_s11   ;;  %s511_s10 = sphi %s537_s10, %s597_s10   ;;  %s507_s9 = sphi %s535_s9, %s596_s9  }
   0x3   : > { %p26_p1 = scmp.ge.s32.totalorder %s24_s12, 2  ;;  %p149_p2 = scmp.lt.s32.totalorder %s515_s11, 3 }
   0x5   : > { %s599_s12 = smov (%p26_p1, %s24_s12), 0  ;;  %p150_p3 = pnand %p451_p0, %p149_p2 }
   0x6   : > { %p187_p4 = scmp.lt.s32.totalorder (!%p150_p3), %s507_s9, 1 }
   0x7   : > { %153 = sbr.rel (%p150_p3) target bundleno = 94 (0x5e), region = 28 }
   0xc   : > { %s601_s9 = smov (!%p187_p4, %s507_s9), 1  ;;  %vm219_vm0 = vcmask 1043456   ;;  %v262_v17 = vlaneseq  ;;  %v517_v53 = vmov 1966171168   ;;  %v518_v61 = vmov 1  }
   0xd   : > { %s458_s13 = sshll.u32 %s601_s9, 3  ;;  %s454_s17 = sshll.u32 %s601_s9, 1  ;;  %v301_v54 = vunpack.c.l.s4 %v517_v53  ;;  %v328_v62 = vcombine.low %v518_v61, %v518_v61 }
   0xe   : > { %s194_s16 = scalar_lea.vmem %s593_s0, %s458_s13  ;;  %v263_v20 = vshrl.u32 %v262_v17, 7  ;;  %s203_s20 = scalar_lea.vmem %s594_s1, %s454_s17  ;;  %vm348_vm7 = vcmp.lt.s32.totalorder %v262_v17, 256 }
   0xf   : > { %v214_v0 = vld [vmem:[%s194_s16] sm:$0xff]  ;;  %v302_v57 = vunpack.c.0.s8 %v301_v54  ;;  %s212_s23 = scalar_lea.vmem %s595_s2, %s454_s17 }
  0x10   : > { %v217_v1 = vcombine.high %v214_v0, %v214_v0  ;;  %v220_v2 = vsel %vm219_vm0, %v214_v0, -inf  ;;  %v266_v21 = vsub.s32 0, %v263_v20  ;;  %v568_v22 = vld [vmem:[%s203_s20] sm:$0x3]  ;;  %v270_v23 = vsub.s32 1, %v263_v20 }
  0x11   : > { %v221_v3 = vrot.slane %v220_v2, 4  ;;  %v305_v60 = vsub.s32 %v302_v57, %v263_v20  ;;  %vm295_vm3 = vcmp.eq.s32.totalorder %v568_v22, 0  ;;  %vm323_vm4 = vcmp.ne.s32.totalorder %v568_v22, 255 }
  0x12   : > { %v227_v4 = vsel %vm219_vm0, %v217_v1, -inf  ;;  %v267_v24 = vrot.slane %v568_v22, %v266_v21  ;;  %v271_v25 = vrot.slane %v568_v22, %v270_v23 }
  0x13   : > { %v222_v5 = vmax.f32 %v220_v2, %v221_v3  ;;  %v228_v6 = vrot.slane %v227_v4, 4  ;;  %v335_v3 = vrot.slane %v328_v62, %v305_v60 }
  0x14   : > { %vm272_vm1 = vcmp.eq.s32.totalorder %v263_v20, %v267_v24  ;;  %vm273_vm2 = vcmp.eq.s32.totalorder %v263_v20, %v271_v25 }
  0x15   : > { %v223_v7 = vrot.slane %v222_v5, 2  ;;  %v229_v8 = vmax.f32 %v227_v4, %v228_v6 }
  0x17   : > { %v224_v9 = vmax.f32 %v222_v5, %v223_v7  ;;  %v230_v10 = vrot.slane %v229_v8, 2 }
  0x19   : > { %v225_v11 = vrot.slane %v224_v9, 1  ;;  %v231_v12 = vmax.f32 %v229_v8, %v230_v10  ;;  %v342_v8 = vrot.slane %v335_v3, %v305_v60 }
  0x1b   : > { %v226_v13 = vmax.f32 %v224_v9, %v225_v11  ;;  %v232_v14 = vrot.slane %v231_v12, 1  ;;  %vm343_vm5 = vcmp.ne.s32.totalorder %v342_v8, 0  ;;  %v519_v11 = vmov 1.0  }
  0x1c   : > { %vm344_vm6 = vmand %vm323_vm4, %vm343_vm5 }
  0x1d   : > { %v233_v15 = vmax.f32 %v231_v12, %v232_v14  ;;  %v296_v12 = vsel %vm295_vm3, 0.1, %v519_v11 }
  0x1f   : > { %v236_v16 = vcombine.low %v226_v13, %v233_v15 }
  0x21   : > { %v238_v18 = vsub.f32 %v214_v0, %v236_v16 }
  0x23   : > { %v239_v19 = vmul.f32 1.442695, %v238_v18  ;;  %v275_v26 = vcombine.high %v238_v18, %v238_v18  ;;  %v277_v28 = vsel %vm272_vm1, %v238_v18, 0.0 }
  0x24   : > { %v279_v34 = vsel %vm219_vm0, %v277_v28, 0.0 }
  0x25   : > { %487 = vpow2.f32 %v239_v19  ;;  %v278_v32 = vsel %vm273_vm2, %v275_v26, 0.0  ;;  %v280_v40 = vrot.slane %v279_v34, 4 }
  0x26   : > { %v286_v37 = vsel %vm219_vm0, %v278_v32, 0.0 }
  0x27   : > { %v287_v43 = vrot.slane %v286_v37, 4  ;;  %v281_v46 = vadd.f32 %v280_v40, %v279_v34 }
  0x29   : > { %v288_v49 = vadd.f32 %v287_v43, %v286_v37  ;;  %v282_v51 = vrot.slane %v281_v46, 2 }
  0x2b   : > { %v289_v52 = vrot.slane %v288_v49, 2  ;;  %v283_v55 = vadd.f32 %v282_v51, %v281_v46 }
  0x2d   : > { %v290_v56 = vadd.f32 %v289_v52, %v288_v49  ;;  %v284_v58 = vrot.slane %v283_v55, 1 }
  0x2f   : > { %v291_v59 = vrot.slane %v290_v56, 1  ;;  %v285_v63 = vadd.f32 %v284_v58, %v283_v55 }
  0x31   : > { %v292_v2 = vadd.f32 %v291_v59, %v290_v56 }
  0x32   : > { %v488_v27 = vpop.eup %487 }
  0x33   : > { %v242_v29 = vcombine.high %v488_v27, %v488_v27  ;;  %v244_v30 = vsel %vm219_vm0, %v488_v27, 0.0 }
  0x34   : > { %v245_v31 = vrot.slane %v244_v30, 4 }
  0x35   : > { %v251_v33 = vsel %vm219_vm0, %v242_v29, 0.0 }
  0x36   : > { %v246_v35 = vadd.f32 %v245_v31, %v244_v30  ;;  %v252_v36 = vrot.slane %v251_v33, 4 }
  0x38   : > { %v247_v38 = vrot.slane %v246_v35, 2  ;;  %v253_v39 = vadd.f32 %v252_v36, %v251_v33 }
  0x3a   : > { %v248_v41 = vadd.f32 %v247_v38, %v246_v35  ;;  %v254_v42 = vrot.slane %v253_v39, 2 }
  0x3c   : > { %v249_v44 = vrot.slane %v248_v41, 1  ;;  %v255_v45 = vadd.f32 %v254_v42, %v253_v39 }
  0x3e   : > { %v250_v47 = vadd.f32 %v249_v44, %v248_v41  ;;  %v256_v48 = vrot.slane %v255_v45, 1 }
  0x40   : > { %v257_v50 = vadd.f32 %v256_v48, %v255_v45  ;;  %489 = vlog2.f32 %v250_v47 }
  0x42   : > { %491 = vlog2.f32 %v257_v50 }
  0x4d   : > { %v490_v0 = vpop.eup %489 }
  0x4e   : > { %v259_v1 = vmul.f32 0.6931472, %v490_v0 }
  0x4f   : > { %v492_v4 = vpop.eup %491 }
  0x50   : > { %v261_v5 = vmul.f32 0.6931472, %v492_v4  ;;  %v293_v6 = vsub.f32 %v259_v1, %v285_v63 }
  0x52   : > { %v294_v7 = vsub.f32 %v261_v5, %v292_v2 }
  0x54   : > { %v299_v9 = vcombine.low %v293_v6, %v294_v7 }
  0x56   : > { %v306_v10 = vrot.slane %v299_v9, %v305_v60 }
  0x58   : > { %v313_v13 = vrot.slane %v306_v10, %v305_v60 }
  0x5a   : > { %v315_v14 = vmul.f32 %v313_v13, %v296_v12 }
  0x5c   : > { %v345_v15 = vsel %vm344_vm6, %v315_v14, -1e+30 }
  0x5d   : > { %350 = vst.msk [vmem:[%s212_s23] sm:$0x3] %vm348_vm7, %v345_v15 }
  0x5e PF: > { %s12_s11 = sadd.s32 1, %s515_s11   ;;  %s596_s9 = smov %s511_s10 }
  0x5f   : > { %p9_p5 = scmp.ge.s32.totalorder %s12_s11, 4   ;;  %s597_s10 = smov %s599_s12 }
  0x61   :  { %11 = sbr.rel (!%p9_p5) target bundleno = 2 (0x2), region = 61 }

</bundles_post_ra>
